<compile_context>
chip_gen: v6e
topology: v6e:2x2x1
jax: 0.10.0
libtpu: 0.0.40
codegen_flags: <defaults>
</compile_context>

<pallas_src>
import functools

import jax
import jax.numpy as jnp
from jax.experimental import pallas as pl
from jax.experimental.pallas import tpu as pltpu


_LANE_CANDIDATES = (4096, 2048, 1024, 512, 256, 128)
_TARGET_TILE_BYTES = 8 * 1024 * 1024   # ~8 MiB blocks: per-step overhead <5% on v7x
_MIN_SPLIT_BYTES = 1 * 1024 * 1024     # below this, one full-array block is cheapest
_MIN_GRID_STEPS = 4                    # keep >=4 steps so v7x megacore gets >=2/TC


@functools.lru_cache(maxsize=1)
def _device_kind() -> str:
    try:
        return jax.devices()[0].device_kind.lower()
    except Exception:
        return ""


@functools.lru_cache(maxsize=1)
def _bf16_native() -> bool:
    # v6e / v7x have bf16-native VPU + EUP; v5e and older do not.
    kind = _device_kind()
    return ("v6" in kind) or ("v7" in kind) or ("tpu7" in kind)


@functools.lru_cache(maxsize=1)
def _vmem_limit_bytes() -> int:
    # v4/v5/v6 have 128 MiB physical VMEM -> 64 MiB scoped limit is safe.
    # v7x (and anything unrecognized) gets a conservative 48 MiB (64 MiB/TC).
    kind = _device_kind()
    if ("v4" in kind) or ("v5" in kind) or ("v6" in kind):
        return 64 * 1024 * 1024
    return 48 * 1024 * 1024


def _compute_dtype(dtype):
    if jnp.dtype(dtype).itemsize >= 4:
        return jnp.float32
    # Sub-32-bit floats: native compute where the VPU/EUP support it, else f32.
    return dtype if _bf16_native() else jnp.float32


def _make_swish_kernel(compute_dtype):
    def kernel(x_ref, o_ref):
        x = x_ref[...].astype(compute_dtype)
        # sigmoid(x) = 0.5 * tanh(0.5 * x) + 0.5  -> a single EUP transcendental
        # per vreg (vs exp + full divide); EUP slot stays hidden under DMA.
        sig = jnp.tanh(x * 0.5) * 0.5 + 0.5
        o_ref[...] = (x * sig).astype(o_ref.dtype)
    return kernel


def _choose_block_rows(rows, lane, itemsize):
    # Sublane packing multiple: 8 for f32, 16 for bf16/f16, 32 for int8/fp8.
    sub = max(8, 32 // itemsize)
    total_bytes = rows * lane * itemsize
    if rows <= sub or total_bytes <= _MIN_SPLIT_BYTES:
        return rows  # single block == full array (no alignment requirement)
    target_rows = max(sub, _TARGET_TILE_BYTES // (lane * itemsize))
    steps_cap = max(sub, rows // _MIN_GRID_STEPS)  # keep >= _MIN_GRID_STEPS steps
    block_rows = min(rows, target_rows, steps_cap)
    return max(sub, (block_rows // sub) * sub)


def _swish_2d(x2d):
    rows, lane = x2d.shape
    itemsize = x2d.dtype.itemsize
    block_rows = _choose_block_rows(rows, lane, itemsize)
    n = rows * lane
    grid = (pl.cdiv(rows, block_rows),)
    return pl.pallas_call(
        _make_swish_kernel(_compute_dtype(x2d.dtype)),
        out_shape=jax.ShapeDtypeStruct((rows, lane), x2d.dtype),
        grid_spec=pltpu.PrefetchScalarGridSpec(
            num_scalar_prefetch=0,
            grid=grid,
            # NOTE: pipeline_mode=pl.Buffered(3) is a further option on v7x if
            # DMA issue latency is still exposed after the 8 MiB tile bump.
            in_specs=[pl.BlockSpec((block_rows, lane), lambda i: (i, 0))],
            out_specs=pl.BlockSpec((block_rows, lane), lambda i: (i, 0)),
        ),
        compiler_params=pltpu.CompilerParams(
            dimension_semantics=("parallel",),
            vmem_limit_bytes=_vmem_limit_bytes(),
        ),
        cost_estimate=pl.CostEstimate(
            flops=4 * n, transcendentals=n, bytes_accessed=2 * n * itemsize),
    )(x2d)


def _swish_jnp(x):
    xf = x.astype(jnp.float32)
    return (xf * jax.nn.sigmoid(xf)).astype(x.dtype)


def swish_pallas(x):
    """Elementwise Swish (x * sigmoid(x)) via Pallas; any shape / float dtype."""
    # TODO(synk): PyTorch's inplace=True mutation has no JAX equivalent
    # (immutable arrays); the out-of-place result is numerically identical.
    orig_shape = x.shape
    total = x.size
    if total == 0:
        return x

    x_flat = x.reshape(-1)
    bulk = (total // 128) * 128
    tail = total - bulk

    if bulk == 0:
        # Tiny (<128 elems): plain jnp, not worth a kernel launch.
        return _swish_jnp(x_flat).reshape(orig_shape)

    # Widest lane width (multiple of 128) dividing the bulk -> lane-dense,
    # unmasked vector stores and big DMA descriptors.
    lane = 128
    for w in _LANE_CANDIDATES:
        if bulk % w == 0:
            lane = w
            break
    rows = bulk // lane

    x_bulk = x_flat if tail == 0 else x_flat[:bulk]
    out_flat = _swish_2d(x_bulk.reshape(rows, lane)).reshape(-1)

    if tail:
        # <128-element tail in plain jnp (avoids a full-tensor pad round trip).
        out_flat = jnp.concatenate([out_flat, _swish_jnp(x_flat[bulk:])])
    return out_flat.reshape(orig_shape)


def _ref_swish(x):
    return x * jax.nn.sigmoid(x)


if __name__ == "__main__":
    key = jax.random.PRNGKey(0)

    # Small NCHW input consistent with typical conv activations (main check).
    x = jax.random.normal(key, (2, 4, 16, 16), dtype=jnp.float32)
    y = jax.block_until_ready(swish_pallas(x))
    assert y.shape == x.shape and y.dtype == x.dtype
    assert jnp.allclose(y, _ref_swish(x), atol=1e-5, rtol=1e-5)

    # Multi-block path (grid > 1, wide lanes, "parallel" megacore sharding).
    k2 = jax.random.PRNGKey(1)
    x2 = jax.random.normal(k2, (8, 16, 64, 64), dtype=jnp.float32)
    y2 = jax.block_until_ready(swish_pallas(x2))
    assert jnp.allclose(y2, _ref_swish(x2), atol=1e-5, rtol=1e-5)

    # Ragged size -> 128-aligned bulk through the kernel + jnp tail.
    k3 = jax.random.PRNGKey(2)
    x3 = jax.random.normal(k3, (5, 7, 11), dtype=jnp.float32)
    y3 = jax.block_until_ready(swish_pallas(x3))
    assert jnp.allclose(y3, _ref_swish(x3), atol=1e-5, rtol=1e-5)

    # bf16 path: native dtype in HBM; native bf16 compute on v6e/v7x.
    x4 = jax.random.normal(key, (2, 8, 16, 16), dtype=jnp.bfloat16)
    y4 = jax.block_until_ready(swish_pallas(x4))
    assert y4.dtype == jnp.bfloat16
    assert jnp.allclose(y4.astype(jnp.float32),
                        _ref_swish(x4.astype(jnp.float32)),
                        atol=2e-2, rtol=2e-2)

    print("KERNEL_OK")
</pallas_src>

<mosaic_0001>
module attributes {stable_mosaic.version = 11 : i64} {
  func.func @kernel(%arg0: i32, %arg1: memref<1x2048xf32, #tpu.memory_space<vmem>>, %arg2: memref<1x2048xf32, #tpu.memory_space<vmem>>) attributes {dimension_semantics = [#tpu.dimension_semantics<parallel>], iteration_bounds = array<i64: 1>, scalar_prefetch = 0 : i64, scratch_operands = 0 : i64, tpu.core_type = #tpu.core_type<tc>, window_params = [{transform_indices = @transform_0, window_bounds = array<i64: 1, 2048>}, {transform_indices = @transform_1, window_bounds = array<i64: 1, 2048>}]} {
    %c0 = arith.constant 0 : index
    %c0_0 = arith.constant 0 : index
    %0 = vector.load %arg1[%c0, %c0_0] : memref<1x2048xf32, #tpu.memory_space<vmem>>, vector<1x2048xf32>
    %cst = arith.constant 5.000000e-01 : f32
    %1 = vector.broadcast %cst : f32 to vector<1x2048xf32>
    %2 = arith.mulf %0, %1 : vector<1x2048xf32>
    %3 = math.tanh %2 : vector<1x2048xf32>
    %cst_1 = arith.constant 5.000000e-01 : f32
    %4 = vector.broadcast %cst_1 : f32 to vector<1x2048xf32>
    %5 = arith.mulf %3, %4 : vector<1x2048xf32>
    %cst_2 = arith.constant 5.000000e-01 : f32
    %6 = vector.broadcast %cst_2 : f32 to vector<1x2048xf32>
    %7 = arith.addf %5, %6 : vector<1x2048xf32>
    %8 = arith.mulf %0, %7 : vector<1x2048xf32>
    %c0_3 = arith.constant 0 : index
    %c0_4 = arith.constant 0 : index
    %9 = vector.load %arg2[%c0_3, %c0_4] : memref<1x2048xf32, #tpu.memory_space<vmem>>, vector<1x2048xf32>
    tpu.vector_store %arg2[%c0_3, %c0_4], %8 {strides = array<i32>} : memref<1x2048xf32, #tpu.memory_space<vmem>>, vector<1x2048xf32>,
    return
  }
  func.func @transform_0(%arg0: i32) -> (i32, i32) {
    %c0_i32 = arith.constant 0 : i32
    %c0_i32_0 = arith.constant 0 : i32
    return %arg0, %c0_i32 : i32, i32
  }
  func.func @transform_1(%arg0: i32) -> (i32, i32) {
    %c0_i32 = arith.constant 0 : i32
    %c0_i32_0 = arith.constant 0 : i32
    return %arg0, %c0_i32 : i32, i32
  }
}

</mosaic_0001>

<bundles_post_ra>
// kernel: tpu_custom_call.1
= control target key start
LH: loop header
LB: loop body
LE: loop exit
PB: predicated region body
PF: predicated region fallthrough
CT: control target
= control target key end

     0   :  { %6 = vsyncpa [#allocation3], 0  ;;  %s118_s0 = inlined_call_operand.hbm [shape: f32[1,2048], index: 0, kind: input, shape index: {}]   ;;  %s119_s1 = inlined_call_operand.hbm [shape: f32[1,2048], index: 1, kind: output, shape index: {}]  }
   0x1   :  { %7 = vsyncpa [#allocation4], 0  ;;  %s100_s6 = smov [#allocation2]  }
   0x2   :  { %s14_s7 = sshll.u32 %s100_s6, 4  ;;  %s15_s7 = int_to_ptr.vmem [resolvable:$true] %s14_s7 }
   0x3   :  { %s64_s8 = scalar_lea.vmem %s15_s7, 256  ;;  %p69_p1 = scmp.lt.s32.totalorder %s15_s7, %s15_s7 }
   0x4   :  { %p65_p0 = scmp.ne.s32.totalorder %s15_s7, %s64_s8  ;;  %p70_p2 = scmp.lt.s32.totalorder %s64_s8, %s64_s8 }
   0x6   :  { %p71_p3 = por %p70_p2, %p69_p1 }
   0x8   :  { %p72_p4 = pnand %p71_p3, %p65_p0 }
   0xa   :  { %75 = shalt.err (!%p72_p4)
}
   0xb   :  { %17 = dma.hbm_to_vmem [thread:$0]  %s118_s0, 256, %s15_s7, [#allocation3]  }
   0xc   :  { %96 = dma.done.wait [#allocation3], 256  }
   0xd   :  { %97 = vsyncadd [#allocation3], 4294967040  ;;  %v21_v0 = vld [vmem:[#allocation2] sm:$0xff]  ;;  %v22_v1 = vld [vmem:[#allocation2 + $0x8] sm:$0xff]  ;;  %s101_s11 = smov [#allocation5]  }
   0xe   :  { %v23_v2 = vmul.f32 0.5, %v21_v0  ;;  %v24_v3 = vmul.f32 0.5, %v22_v1  ;;  %s41_s12 = sshll.u32 %s101_s11, 4  ;;  %s42_s12 = int_to_ptr.vmem [resolvable:$true] %s41_s12 }
   0xf   :  { %s76_s0 = scalar_lea.vmem %s42_s12, 256  ;;  %p81_p6 = scmp.lt.s32.totalorder %s42_s12, %s42_s12 }
  0x10   :  { %52 = vtanh.f32 %v23_v2  ;;  %p77_p5 = scmp.ne.s32.totalorder %s42_s12, %s76_s0  ;;  %p82_p7 = scmp.lt.s32.totalorder %s76_s0, %s76_s0 }
  0x11   :  { %54 = vtanh.f32 %v24_v3 }
  0x12   :  { %p83_p8 = por %p82_p7, %p81_p6 }
  0x14   :  { %p84_p9 = pnand %p83_p8, %p77_p5 }
  0x1d   :  { %v53_v4 = vpop.eup %52 }
  0x1e   :  { %v55_v5 = vpop.eup %54  ;;  %v27_v6 = vmul.f32 0.5, %v53_v4 }
  0x1f   :  { %v28_v7 = vmul.f32 0.5, %v55_v5 }
  0x20   :  { %v29_v8 = vadd.f32 0.5, %v27_v6 }
  0x21   :  { %v30_v9 = vadd.f32 0.5, %v28_v7 }
  0x22   :  { %v31_v10 = vmul.f32 %v29_v8, %v21_v0 }
  0x23   :  { %v32_v11 = vmul.f32 %v30_v9, %v22_v1 }
  0x24   :  { %33 = vst [vmem:[#allocation5] sm:$0xff] %v31_v10 }
  0x25   :  { %34 = vst [vmem:[#allocation5 + $0x8] sm:$0xff] %v32_v11 }
  0x26   :  { %87 = shalt.err (!%p84_p9)
}
  0x27   :  { %44 = dma.vmem_to_hbm [thread:$0]  %s42_s12, 256, %s119_s1, [#allocation4]  }
  0x28   :  { %98 = dma.done.wait [#allocation4], 256  }
  0x29   :  { %99 = vsyncadd [#allocation4], 4294967040 }
  0x2a   :  { %48 = vsyncpa [#allocation3], 1 }
  0x2b   :  { %49 = vsyncpa [#allocation4], 1 }

</bundles_post_ra>
